<compile_context>
chip_gen: v7x
topology: tpu7x:2x2x1
jax: 0.10.0
libtpu: 0.0.40
codegen_flags: <defaults>
</compile_context>

<pallas_src>
import jax
import jax.numpy as jnp
from jax.experimental import pallas as pl
from jax.experimental.pallas import tpu as pltpu

EPS = 1e-8
_MAX_STATIC_UNROLL_L = 8


def _round_up(x, m):
    return ((x + m - 1) // m) * m


def _vmem_limit_bytes():
    """Generation-aware VMEM limit for the pallas_call."""
    cap = None
    try:
        cap = int(pltpu.get_tpu_info().vmem_capacity_bytes)
    except Exception:  # emulated backends / API drift: be conservative
        cap = None
    if cap is None or cap <= 0:
        cap = 64 * 1024 * 1024            # assume v7x-class per-core VMEM
    if cap <= 64 * 1024 * 1024:           # v7x: 64 MiB per TensorCore
        return 44 * 1024 * 1024
    return 64 * 1024 * 1024               # v5e / v6e: 128 MiB physical


def _choose_tile_o(L, O, D, itemsize, vmem_limit_bytes):
    """Pick the O-tile size.

    Accounts for the double-buffered streamed (L, TO, Dp) slab plus the
    materialized f32 (TO, Dp) layer-sum temp under the VMEM limit, and targets
    a multi-MiB per-step tile so the kernel stays at the HBM roofline instead
    of being per-grid-step-overhead bound.
    """
    dp = _round_up(max(D, 1), 128)        # lane-padded width inside VMEM
    row_stream = L * dp * itemsize        # one O-row of the streamed W slab
    row_temp = dp * 4                     # one O-row of the f32 sum_w temp
    per_row = 2 * row_stream + row_temp   # 2x double-buffer + temp
    budget = int(vmem_limit_bytes * 0.70)  # headroom: outputs, small temps
    granule = {4: 8, 2: 16, 1: 32}.get(itemsize, 8)  # sublane rule per dtype

    if O <= granule:
        if per_row * O > budget:
            # TODO(synk): huge L*D needs an L-chunked two-pass kernel (mean
            # pass + ratio pass over an extra grid axis).
            raise ValueError(
                f"WeightDistance kernel: tile does not fit VMEM "
                f"(L={L}, D={D}, O={O}, vmem_limit={vmem_limit_bytes}).")
        return int(O)                      # full-extent block: always legal

    fit = budget // per_row
    # v5e/v6e (128 MiB): ~8 MiB streamed tile; v7x (64 MiB): ~6 MiB.
    target_bytes = (8 if vmem_limit_bytes >= 48 * 1024 * 1024 else 6) * 1024 * 1024
    want = max(granule, target_bytes // row_stream)
    upper = (O // granule) * granule       # keep block dim <= O
    to = min(fit, want, upper)
    to = (to // granule) * granule
    if to < granule:
        # TODO(synk): huge L*D needs an L-chunked two-pass kernel variant.
        raise ValueError(
            f"WeightDistance kernel: even TO={granule} does not fit VMEM "
            f"(L={L}, D={D}, vmem_limit={vmem_limit_bytes}).")
    return int(to)


def _make_kernel(L, O, TO):
    inv_l = 1.0 / L

    def kernel(w_ref, out_ref):
        # w_ref:   (L, TO, D) streamed tile of the stacked conv weights
        #          (D = full logical width; lane padding handled by Mosaic).
        # out_ref: (1, 1, 128) per-tile partial sum of cosine ratios.
        row_ids = jax.lax.broadcasted_iota(jnp.int32, (TO, 1), 0)
        valid = (row_ids + pl.program_id(0) * TO) < O          # (TO, 1)

        if L <= _MAX_STATIC_UNROLL_L:
            # Fused pass 1: layer sum + per-layer squared norms.
            w0 = w_ref[0].astype(jnp.float32)
            sum_w = w0
            sqs = [jnp.sum(w0 * w0, axis=1, keepdims=True)]
            for i in range(1, L):
                wi = w_ref[i].astype(jnp.float32)
                sqs.append(jnp.sum(wi * wi, axis=1, keepdims=True))
                sum_w = sum_w + wi
            # ||mean_w||^2 = ||sum_w||^2 / L^2 ; 1/L is folded into (TO,1)
            # scalars only -- never a full-tile multiply.
            mean_sq = jnp.sum(sum_w * sum_w, axis=1, keepdims=True) * (inv_l * inv_l)
            sqrt_mw = jnp.sqrt(mean_sq + EPS)                   # (TO, 1)
            ratio_acc = jnp.zeros((TO, 1), jnp.float32)
            for i in range(L):
                wi = w_ref[i].astype(jnp.float32)
                nom = jnp.sum(sum_w * wi, axis=1, keepdims=True) * inv_l
                den = sqrt_mw * jnp.sqrt(sqs[i] + EPS) + EPS    # exact ref den
                ratio_acc = ratio_acc + nom / den
        else:
            # Large L: bounded live ranges via fori_loop (small unroll).
            def mean_body(i, acc):
                return acc + w_ref[i].astype(jnp.float32)
            sum_w = jax.lax.fori_loop(1, L, mean_body,
                                      w_ref[0].astype(jnp.float32), unroll=2)
            mean_sq = jnp.sum(sum_w * sum_w, axis=1, keepdims=True) * (inv_l * inv_l)
            sqrt_mw = jnp.sqrt(mean_sq + EPS)

            def ratio_body(i, acc):
                wi = w_ref[i].astype(jnp.float32)
                nom = jnp.sum(sum_w * wi, axis=1, keepdims=True) * inv_l
                sq = jnp.sum(wi * wi, axis=1, keepdims=True)
                den = sqrt_mw * jnp.sqrt(sq + EPS) + EPS
                return acc + nom / den
            ratio_acc = jax.lax.fori_loop(0, L, ratio_body,
                                          jnp.zeros((TO, 1), jnp.float32),
                                          unroll=2)

        # Mandatory O-tail mask: rows past O hold unspecified data.
        ratio_acc = jnp.where(valid, ratio_acc, 0.0)
        out_ref[...] = jnp.full(out_ref.shape, jnp.sum(ratio_acc),
                                dtype=jnp.float32)

    return kernel


def _bias_cosine_sum(stacked_biases):
    """Exact reference bias path: cos(mean_b.reshape(-1,1), b_i.reshape(-1,1))."""
    b = stacked_biases.astype(jnp.float32)                      # (L, O)
    mean_b = jnp.mean(b, axis=0, keepdims=True)                 # (1, O)
    nom = mean_b * b
    den = jnp.sqrt(mean_b * mean_b + EPS) * jnp.sqrt(b * b + EPS) + EPS
    return jnp.sum((nom / den + 1.0) * 0.5)


def weight_distance(stacked_weights, stacked_biases=None):
    """stacked_weights: (L, O, D); stacked_biases: (L, O) or None -> scalar f32."""
    L, O, D = stacked_weights.shape
    itemsize = jnp.dtype(stacked_weights.dtype).itemsize
    vmem_limit = _vmem_limit_bytes()
    TO = _choose_tile_o(L, O, D, itemsize, vmem_limit)
    num_tiles = pl.cdiv(O, TO)

    partials = pl.pallas_call(
        _make_kernel(L, O, TO),
        out_shape=jax.ShapeDtypeStruct((num_tiles, 1, 128), jnp.float32),
        grid=(num_tiles,),
        in_specs=[
            # Streamed W tiles; last dim = full array extent (no host pad).
            pl.BlockSpec((L, TO, D), lambda o: (0, o, 0)),
        ],
        out_specs=pl.BlockSpec((1, 1, 128), lambda o: (o, 0, 0)),
        compiler_params=pltpu.CompilerParams(
            dimension_semantics=("parallel",),
            vmem_limit_bytes=vmem_limit,
        ),
    )(stacked_weights)

    # sum_i ((r_i + 1)/2) over the L*O valid weight rows.
    total = 0.5 * jnp.sum(partials[:, 0, 0]) + jnp.float32(0.5 * L * O)
    if stacked_biases is not None:
        # O(L*O) work: computed in plain JAX per perf review (keeps the
        # streamed kernel symmetric across tiles / cores).
        total = total + _bias_cosine_sum(stacked_biases)
    return total


def _reference(stacked_weights, stacked_biases):
    """Plain-JAX transcription of WeightDistance.forward / .cos."""
    w = stacked_weights.astype(jnp.float32)
    b = stacked_biases.astype(jnp.float32)
    mean_w = jnp.mean(w, axis=0)
    mean_b = jnp.mean(b, axis=0)
    total = jnp.float32(0.0)
    for i in range(w.shape[0]):
        wi = w[i]
        nom = jnp.sum(mean_w * wi, axis=1)
        den = (jnp.sqrt(jnp.sum(mean_w ** 2, axis=1) + EPS)
               * jnp.sqrt(jnp.sum(wi ** 2, axis=1) + EPS) + EPS)
        total = total + jnp.sum((nom / den + 1.0) / 2.0)
        bi = b[i]
        nom_b = mean_b * bi
        den_b = (jnp.sqrt(mean_b ** 2 + EPS) * jnp.sqrt(bi ** 2 + EPS) + EPS)
        total = total + jnp.sum((nom_b / den_b + 1.0) / 2.0)
    return total


if __name__ == "__main__":
    # Synthetic "layers": L Conv2d(C, O, K, K) layers -> weight (O, C, K, K),
    # bias (O,). Deterministic init from PRNGKey(0).
    L, O, C, K = 3, 8, 4, 3
    D = C * K * K

    key = jax.random.PRNGKey(0)
    kw, kb = jax.random.split(key)
    conv_weights = jax.random.normal(kw, (L, O, C, K, K), dtype=jnp.float32)
    conv_biases = jax.random.normal(kb, (L, O), dtype=jnp.float32)

    # Flatten each layer's conv weight to (O, D) as the module does.
    stacked_w = conv_weights.reshape(L, O, D)

    dist = weight_distance(stacked_w, conv_biases)
    dist = jax.block_until_ready(dist)

    ref = _reference(stacked_w, conv_biases)
    assert jnp.allclose(dist, ref, rtol=1e-5, atol=1e-5), (dist, ref)

    print("KERNEL_OK")
</pallas_src>

<mosaic_0001>
module attributes {stable_mosaic.version = 11 : i64} {
  func.func @kernel(%arg0: i32, %arg1: memref<3x8x36xf32, #tpu.memory_space<vmem>>, %arg2: memref<1x1x128xf32, #tpu.memory_space<vmem>>) attributes {dimension_semantics = [#tpu.dimension_semantics<parallel>], iteration_bounds = array<i64: 1>, scalar_prefetch = 0 : i64, scratch_operands = 0 : i64, tpu.core_type = #tpu.core_type<tc>, window_params = [{transform_indices = @transform_0, window_bounds = array<i64: 3, 8, 36>}, {transform_indices = @transform_1, window_bounds = array<i64: 1, 1, 128>}]} {
    %0 = tpu.iota {dimensions = array<i32: 0>} : vector<8x1xi32>
    %c8_i32 = arith.constant 8 : i32
    %1 = arith.muli %arg0, %c8_i32 : i32
    %2 = vector.broadcast %1 : i32 to vector<8x1xi32>
    %3 = arith.addi %0, %2 : vector<8x1xi32>
    %c8_i32_0 = arith.constant 8 : i32
    %4 = vector.broadcast %c8_i32_0 : i32 to vector<8x1xi32>
    %5 = arith.cmpi slt, %3, %4 : vector<8x1xi32>
    %c0 = arith.constant 0 : index
    %c0_1 = arith.constant 0 : index
    %c0_2 = arith.constant 0 : index
    %6 = vector.load %arg1[%c0, %c0_1, %c0_2] : memref<3x8x36xf32, #tpu.memory_space<vmem>>, vector<1x8x36xf32>
    %7 = vector.shape_cast %6 : vector<1x8x36xf32> to vector<8x36xf32>
    %8 = arith.mulf %7, %7 : vector<8x36xf32>
    %cst = arith.constant dense<0.000000e+00> : vector<8xf32>
    %9 = vector.multi_reduction <add>, %8, %cst [1] : vector<8x36xf32> to vector<8xf32>
    %10 = vector.shape_cast %9 : vector<8xf32> to vector<8x1xf32>
    %c1 = arith.constant 1 : index
    %c0_3 = arith.constant 0 : index
    %c0_4 = arith.constant 0 : index
    %11 = vector.load %arg1[%c1, %c0_3, %c0_4] : memref<3x8x36xf32, #tpu.memory_space<vmem>>, vector<1x8x36xf32>
    %12 = vector.shape_cast %11 : vector<1x8x36xf32> to vector<8x36xf32>
    %13 = arith.mulf %12, %12 : vector<8x36xf32>
    %cst_5 = arith.constant dense<0.000000e+00> : vector<8xf32>
    %14 = vector.multi_reduction <add>, %13, %cst_5 [1] : vector<8x36xf32> to vector<8xf32>
    %15 = vector.shape_cast %14 : vector<8xf32> to vector<8x1xf32>
    %16 = arith.addf %7, %12 : vector<8x36xf32>
    %c2 = arith.constant 2 : index
    %c0_6 = arith.constant 0 : index
    %c0_7 = arith.constant 0 : index
    %17 = vector.load %arg1[%c2, %c0_6, %c0_7] : memref<3x8x36xf32, #tpu.memory_space<vmem>>, vector<1x8x36xf32>
    %18 = vector.shape_cast %17 : vector<1x8x36xf32> to vector<8x36xf32>
    %19 = arith.mulf %18, %18 : vector<8x36xf32>
    %cst_8 = arith.constant dense<0.000000e+00> : vector<8xf32>
    %20 = vector.multi_reduction <add>, %19, %cst_8 [1] : vector<8x36xf32> to vector<8xf32>
    %21 = vector.shape_cast %20 : vector<8xf32> to vector<8x1xf32>
    %22 = arith.addf %16, %18 : vector<8x36xf32>
    %23 = arith.mulf %22, %22 : vector<8x36xf32>
    %cst_9 = arith.constant dense<0.000000e+00> : vector<8xf32>
    %24 = vector.multi_reduction <add>, %23, %cst_9 [1] : vector<8x36xf32> to vector<8xf32>
    %25 = vector.shape_cast %24 : vector<8xf32> to vector<8x1xf32>
    %cst_10 = arith.constant 0.111111112 : f32
    %26 = vector.broadcast %cst_10 : f32 to vector<8x1xf32>
    %27 = arith.mulf %25, %26 : vector<8x1xf32>
    %cst_11 = arith.constant 9.99999993E-9 : f32
    %28 = vector.broadcast %cst_11 : f32 to vector<8x1xf32>
    %29 = arith.addf %27, %28 : vector<8x1xf32>
    %30 = math.sqrt %29 : vector<8x1xf32>
    %cst_12 = arith.constant 0.000000e+00 : f32
    %31 = vector.broadcast %cst_12 : f32 to vector<8x1xf32>
    %c0_13 = arith.constant 0 : index
    %c0_14 = arith.constant 0 : index
    %c0_15 = arith.constant 0 : index
    %32 = vector.load %arg1[%c0_13, %c0_14, %c0_15] : memref<3x8x36xf32, #tpu.memory_space<vmem>>, vector<1x8x36xf32>
    %33 = vector.shape_cast %32 : vector<1x8x36xf32> to vector<8x36xf32>
    %34 = arith.mulf %22, %33 : vector<8x36xf32>
    %cst_16 = arith.constant dense<0.000000e+00> : vector<8xf32>
    %35 = vector.multi_reduction <add>, %34, %cst_16 [1] : vector<8x36xf32> to vector<8xf32>
    %36 = vector.shape_cast %35 : vector<8xf32> to vector<8x1xf32>
    %cst_17 = arith.constant 0.333333343 : f32
    %37 = vector.broadcast %cst_17 : f32 to vector<8x1xf32>
    %38 = arith.mulf %36, %37 : vector<8x1xf32>
    %cst_18 = arith.constant 9.99999993E-9 : f32
    %39 = vector.broadcast %cst_18 : f32 to vector<8x1xf32>
    %40 = arith.addf %10, %39 : vector<8x1xf32>
    %41 = math.sqrt %40 : vector<8x1xf32>
    %42 = arith.mulf %30, %41 : vector<8x1xf32>
    %cst_19 = arith.constant 9.99999993E-9 : f32
    %43 = vector.broadcast %cst_19 : f32 to vector<8x1xf32>
    %44 = arith.addf %42, %43 : vector<8x1xf32>
    %45 = arith.divf %38, %44 : vector<8x1xf32>
    %46 = arith.addf %31, %45 : vector<8x1xf32>
    %c1_20 = arith.constant 1 : index
    %c0_21 = arith.constant 0 : index
    %c0_22 = arith.constant 0 : index
    %47 = vector.load %arg1[%c1_20, %c0_21, %c0_22] : memref<3x8x36xf32, #tpu.memory_space<vmem>>, vector<1x8x36xf32>
    %48 = vector.shape_cast %47 : vector<1x8x36xf32> to vector<8x36xf32>
    %49 = arith.mulf %22, %48 : vector<8x36xf32>
    %cst_23 = arith.constant dense<0.000000e+00> : vector<8xf32>
    %50 = vector.multi_reduction <add>, %49, %cst_23 [1] : vector<8x36xf32> to vector<8xf32>
    %51 = vector.shape_cast %50 : vector<8xf32> to vector<8x1xf32>
    %cst_24 = arith.constant 0.333333343 : f32
    %52 = vector.broadcast %cst_24 : f32 to vector<8x1xf32>
    %53 = arith.mulf %51, %52 : vector<8x1xf32>
    %cst_25 = arith.constant 9.99999993E-9 : f32
    %54 = vector.broadcast %cst_25 : f32 to vector<8x1xf32>
    %55 = arith.addf %15, %54 : vector<8x1xf32>
    %56 = math.sqrt %55 : vector<8x1xf32>
    %57 = arith.mulf %30, %56 : vector<8x1xf32>
    %cst_26 = arith.constant 9.99999993E-9 : f32
    %58 = vector.broadcast %cst_26 : f32 to vector<8x1xf32>
    %59 = arith.addf %57, %58 : vector<8x1xf32>
    %60 = arith.divf %53, %59 : vector<8x1xf32>
    %61 = arith.addf %46, %60 : vector<8x1xf32>
    %c2_27 = arith.constant 2 : index
    %c0_28 = arith.constant 0 : index
    %c0_29 = arith.constant 0 : index
    %62 = vector.load %arg1[%c2_27, %c0_28, %c0_29] : memref<3x8x36xf32, #tpu.memory_space<vmem>>, vector<1x8x36xf32>
    %63 = vector.shape_cast %62 : vector<1x8x36xf32> to vector<8x36xf32>
    %64 = arith.mulf %22, %63 : vector<8x36xf32>
    %cst_30 = arith.constant dense<0.000000e+00> : vector<8xf32>
    %65 = vector.multi_reduction <add>, %64, %cst_30 [1] : vector<8x36xf32> to vector<8xf32>
    %66 = vector.shape_cast %65 : vector<8xf32> to vector<8x1xf32>
    %cst_31 = arith.constant 0.333333343 : f32
    %67 = vector.broadcast %cst_31 : f32 to vector<8x1xf32>
    %68 = arith.mulf %66, %67 : vector<8x1xf32>
    %cst_32 = arith.constant 9.99999993E-9 : f32
    %69 = vector.broadcast %cst_32 : f32 to vector<8x1xf32>
    %70 = arith.addf %21, %69 : vector<8x1xf32>
    %71 = math.sqrt %70 : vector<8x1xf32>
    %72 = arith.mulf %30, %71 : vector<8x1xf32>
    %cst_33 = arith.constant 9.99999993E-9 : f32
    %73 = vector.broadcast %cst_33 : f32 to vector<8x1xf32>
    %74 = arith.addf %72, %73 : vector<8x1xf32>
    %75 = arith.divf %68, %74 : vector<8x1xf32>
    %76 = arith.addf %61, %75 : vector<8x1xf32>
    %cst_34 = arith.constant 0.000000e+00 : f32
    %77 = vector.broadcast %cst_34 : f32 to vector<8x1xf32>
    %78 = arith.select %5, %76, %77 : vector<8x1xi1>, vector<8x1xf32>
    %79 = vector.shape_cast %78 : vector<8x1xf32> to vector<1x8x1xf32>
    %cst_35 = arith.constant dense<0.000000e+00> : vector<1xf32>
    %80 = vector.multi_reduction <add>, %79, %cst_35 [1, 2] : vector<1x8x1xf32> to vector<1xf32>
    %81 = vector.shape_cast %80 : vector<1xf32> to vector<1x1x1xf32>
    %82 = vector.extract %81[0, 0, 0] : f32 from vector<1x1x1xf32>
    %83 = vector.broadcast %82 : f32 to vector<1x1x128xf32>
    %c0_36 = arith.constant 0 : index
    %c0_37 = arith.constant 0 : index
    %c0_38 = arith.constant 0 : index
    %84 = vector.load %arg2[%c0_36, %c0_37, %c0_38] : memref<1x1x128xf32, #tpu.memory_space<vmem>>, vector<1x1x128xf32>
    tpu.vector_store %arg2[%c0_36, %c0_37, %c0_38], %83 {strides = array<i32>} : memref<1x1x128xf32, #tpu.memory_space<vmem>>, vector<1x1x128xf32>,
    return
  }
  func.func @transform_0(%arg0: i32) -> (i32, i32, i32) {
    %c0_i32 = arith.constant 0 : i32
    %c0_i32_0 = arith.constant 0 : i32
    %c0_i32_1 = arith.constant 0 : i32
    return %c0_i32, %arg0, %c0_i32_0 : i32, i32, i32
  }
  func.func @transform_1(%arg0: i32) -> (i32, i32, i32) {
    %c0_i32 = arith.constant 0 : i32
    %c0_i32_0 = arith.constant 0 : i32
    %c0_i32_1 = arith.constant 0 : i32
    return %arg0, %c0_i32, %c0_i32_0 : i32, i32, i32
  }
}

</mosaic_0001>

<bundles_post_ra>
// kernel: tpu_custom_call.1
= control target key start
LH: loop header
LB: loop body
LE: loop exit
PB: predicated region body
PF: predicated region fallthrough
CT: control target
= control target key end

     0   :  { %6 = vsyncpa [#allocation3], 0  ;;  %s258_s0 = inlined_call_operand.hbm [shape: f32[3,8,36], index: 0, kind: input, shape index: {}]   ;;  %s259_s1 = inlined_call_operand.hbm [shape: f32[1,1,128], index: 1, kind: output, shape index: {}]  }
   0x1   :  { %7 = vsyncpa [#allocation4], 0  ;;  %s213_s6 = smov [#allocation2]   ;;  %s165_s10 = scalar_lea.hbm %s258_s0, 384 }
   0x2   :  { %s13_s7 = sshll.u32 %s213_s6, 4  ;;  %p166_p0 = scmp.ne.s32.totalorder %s258_s0, %s165_s10  ;;  %s14_s7 = int_to_ptr.vmem [resolvable:$true] %s13_s7 }
   0x3   :  { %p169_p1 = scmp.lt.u32.totalorder %s165_s10, %s258_s0 }
   0x5   :  { %p171_p2 = pnand %p169_p1, %p166_p0 }
   0x7   :  { %174 = shalt.err (!%p171_p2)
}
   0x8   :  { %s175_s15 = scalar_lea.vmem %s14_s7, 384  ;;  %p180_p4 = scmp.lt.s32.totalorder %s14_s7, %s14_s7 }
   0x9   :  { %p176_p3 = scmp.ne.s32.totalorder %s14_s7, %s175_s15  ;;  %p181_p5 = scmp.lt.s32.totalorder %s175_s15, %s175_s15 }
   0xb   :  { %p182_p6 = por %p181_p5, %p180_p4 }
   0xd   :  { %p183_p7 = pnand %p182_p6, %p176_p3 }
   0xf   :  { %186 = shalt.err (!%p183_p7)
}
  0x10   :  { %s214_s16 = smov 128   ;;  %s215_s17 = smov 8  }
  0x11   :  { %19 = dma.hbm_to_vmem [thread:$0]  %s258_s0, 384, %s14_s7, [#allocation3], %s214_s16, %s214_s16, %s215_s17  }
  0x12   :  { %209 = dma.done.wait [#allocation3], 384  }
  0x13   :  { %210 = vsyncadd [#allocation3], 4294966912  ;;  %vm31_vm0 = vcmask 293888   ;;  %v36_v0 = vld [vmem:[#allocation2 + $0x8] sm:$0xff]  ;;  %v29_v1 = vld [vmem:[#allocation2] sm:$0xff]  ;;  %vm117_vm9 = vcmask 7168  }
  0x14   :  { %v43_v2 = vld [vmem:[#allocation2 + $0x10] sm:$0xff]  ;;  %v37_v3 = vmul.f32 %v36_v0, %v36_v0  ;;  %v41_v4 = vadd.f32 %v36_v0, %v29_v1  ;;  %v30_v10 = vmul.f32 %v29_v1, %v29_v1  ;;  %s216_s0 = smov [#allocation5]  }
  0x15   :  { %v44_v5 = vmul.f32 %v43_v2, %v43_v2  ;;  %s136_s20 = sshll.u32 %s216_s0, 4  ;;  %s137_s20 = int_to_ptr.vmem [resolvable:$true] %s136_s20 }
  0x16   :  { %v38_v6 = vsel %vm31_vm0, %v37_v3, 0.0  ;;  %v48_v7 = vadd.f32 %v43_v2, %v41_v4  ;;  %v32_v13 = vsel %vm31_vm0, %v30_v10, 0.0  ;;  %s187_s22 = scalar_lea.vmem %s137_s20, 16  ;;  %s191_s23 = scalar_lea.vmem %s137_s20, 32 }
  0x17   :  { %39 = vadd.xlane.f32.xlu1 %v38_v6  ;;  %v45_v8 = vsel %vm31_vm0, %v44_v5, 0.0  ;;  %p188_p8 = scmp.ne.s32.totalorder %s137_s20, %s187_s22  ;;  %p192_p9 = scmp.lt.s32.totalorder %s137_s20, %s137_s20 }
  0x18   :  { %v49_v9 = vmul.f32 %v48_v7, %v48_v7  ;;  %v80_v11 = vmul.f32 %v48_v7, %v36_v0  ;;  %v62_v14 = vmul.f32 %v48_v7, %v29_v1  ;;  %v98_v17 = vmul.f32 %v48_v7, %v43_v2  ;;  %p193_p10 = scmp.lt.s32.totalorder %s191_s23, %s187_s22 }
  0x1a   :  { %v50_v12 = vsel %vm31_vm0, %v49_v9, 0.0  ;;  %v81_v15 = vsel %vm31_vm0, %v80_v11, 0.0  ;;  %v63_v16 = vsel %vm31_vm0, %v62_v14, 0.0  ;;  %v99_v18 = vsel %vm31_vm0, %v98_v17, 0.0  ;;  %p194_p11 = por %p193_p10, %p192_p9 }
  0x1b   :  { %46 = vadd.xlane.f32.xlu1 %v45_v8  ;;  %51 = vadd.xlane.f32.xlu0 %v50_v12 }
  0x1c   :  { %p195_p12 = pnand %p194_p11, %p188_p8 }
  0x1f   :  { %33 = vadd.xlane.f32.xlu0 %v32_v13  ;;  %82 = vadd.xlane.f32.xlu1 %v81_v15 }
  0x23   :  { %64 = vadd.xlane.f32.xlu0 %v63_v16 }
  0x27   :  { %100 = vadd.xlane.f32.xlu0 %v99_v18 }
  0xa4   :  { %v40_v19 = vpop.xlane.xlu1 %39 }
  0xa5   :  { %v85_v20 = vadd.f32 1e-08, %v40_v19 }
  0xa7   :  { %151 = vrsqrt.f32 %v85_v20  ;;  %vm88_vm1 = vcmp.eq.f32.partialorder %v85_v20, inf  ;;  %v91_v33 = vand.u32 2147483648, %v85_v20  ;;  %vm90_vm3 = vcmp.eq.f32.partialorder %v85_v20, 0.0 }
  0xa8   :  { %v47_v21 = vpop.xlane.xlu1 %46  ;;  %v52_v22 = vpop.xlane.xlu0 %51 }
  0xa9   :  { %v103_v23 = vadd.f32 1e-08, %v47_v21  ;;  %v53_v24 = vmul.f32 0.11111111, %v52_v22 }
  0xab   :  { %153 = vrsqrt.f32 %v103_v23  ;;  %v54_v25 = vadd.f32 1e-08, %v53_v24  ;;  %vm106_vm2 = vcmp.eq.f32.partialorder %v103_v23, inf  ;;  %v109_v38 = vand.u32 2147483648, %v103_v23 }
  0xac   :  { %v34_v26 = vpop.xlane.xlu0 %33  ;;  %vm108_vm5 = vcmp.eq.f32.partialorder %v103_v23, 0.0  ;;  %v83_v55 = vpop.xlane.xlu1 %82 }
  0xad   :  { %155 = vrsqrt.f32 %v54_v25  ;;  %v67_v27 = vadd.f32 1e-08, %v34_v26  ;;  %vm57_vm4 = vcmp.eq.f32.partialorder %v54_v25, inf  ;;  %v60_v39 = vand.u32 2147483648, %v54_v25 }
  0xae   :  { %vm59_vm7 = vcmp.eq.f32.partialorder %v54_v25, 0.0  ;;  %v84_v57 = vmul.f32 0.33333334, %v83_v55 }
  0xaf   :  { %157 = vrsqrt.f32 %v67_v27  ;;  %vm70_vm6 = vcmp.eq.f32.partialorder %v67_v27, inf  ;;  %v73_v42 = vand.u32 2147483648, %v67_v27  ;;  %vm72_vm8 = vcmp.eq.f32.partialorder %v67_v27, 0.0 }
  0xb0   :  { %v65_v54 = vpop.xlane.xlu0 %64 }
  0xb1   :  { %v152_v28 = vpop.eup %151  ;;  %v66_v60 = vmul.f32 0.33333334, %v65_v54 }
  0xb2   :  { %v87_v29 = vmul.f32 %v152_v28, %v85_v20 }
  0xb4   :  { %v89_v35 = vsel %vm88_vm1, %v85_v20, %v87_v29  ;;  %v101_v56 = vpop.xlane.xlu0 %100 }
  0xb5   :  { %v154_v30 = vpop.eup %153  ;;  %v92_v44 = vsel %vm90_vm3, %v91_v33, %v89_v35  ;;  %v102_v61 = vmul.f32 0.33333334, %v101_v56 }
  0xb6   :  { %v105_v31 = vmul.f32 %v154_v30, %v103_v23 }
  0xb7   :  { %v156_v32 = vpop.eup %155 }
  0xb8   :  { %v56_v34 = vmul.f32 %v156_v32, %v54_v25  ;;  %v107_v36 = vsel %vm106_vm2, %v103_v23, %v105_v31 }
  0xb9   :  { %v158_v37 = vpop.eup %157  ;;  %v110_v45 = vsel %vm108_vm5, %v109_v38, %v107_v36 }
  0xba   :  { %v69_v40 = vmul.f32 %v158_v37, %v67_v27  ;;  %v58_v41 = vsel %vm57_vm4, %v54_v25, %v56_v34 }
  0xbb   :  { %v61_v43 = vsel %vm59_vm7, %v60_v39, %v58_v41 }
  0xbc   :  { %v71_v46 = vsel %vm70_vm6, %v67_v27, %v69_v40  ;;  %v93_v47 = vmul.f32 %v92_v44, %v61_v43  ;;  %v111_v48 = vmul.f32 %v110_v45, %v61_v43 }
  0xbd   :  { %v74_v49 = vsel %vm72_vm8, %v73_v42, %v71_v46 }
  0xbe   :  { %v75_v50 = vmul.f32 %v74_v49, %v61_v43  ;;  %v94_v51 = vadd.f32 1e-08, %v93_v47  ;;  %v112_v52 = vadd.f32 1e-08, %v111_v48 }
  0xc0   :  { %v76_v53 = vadd.f32 1e-08, %v75_v50  ;;  %159 = vrcp.f32 %v94_v51 }
  0xc1   :  { %161 = vrcp.f32 %v112_v52 }
  0xc2   :  { %163 = vrcp.f32 %v76_v53 }
  0xca   :  { %v160_v58 = vpop.eup %159 }
  0xcb   :  { %v162_v59 = vpop.eup %161  ;;  %v96_v0 = vmul.f32 %v160_v58, %v84_v57 }
  0xcc   :  { %v164_v62 = vpop.eup %163  ;;  %v114_v1 = vmul.f32 %v162_v59, %v102_v61 }
  0xcd   :  { %v78_v63 = vmul.f32 %v164_v62, %v66_v60 }
  0xcf   :  { %v97_v2 = vadd.f32 %v96_v0, %v78_v63 }
  0xd1   :  { %v115_v3 = vadd.f32 %v114_v1, %v97_v2 }
  0xd3   :  { %v118_v4 = vsel %vm117_vm9, %v115_v3, 0.0 }
  0xd4   :  { %119 = vadd.xlane.f32.xlu1 %v118_v4 }
 0x161   :  { %v120_v5 = vpop.xlane.xlu1 %119 }
 0x162   :  { %v121_v6 = vrot.slane %v120_v5, 4 }
 0x164   :  { %v122_v7 = vadd.f32 %v121_v6, %v120_v5 }
 0x166   :  { %v123_v8 = vrot.slane %v122_v7, 2 }
 0x168   :  { %v124_v9 = vadd.f32 %v123_v8, %v122_v7 }
 0x16a   :  { %v125_v10 = vrot.slane %v124_v9, 1 }
 0x16c   :  { %v126_v11 = vadd.f32 %v125_v10, %v124_v9 }
 0x16e   :  { %145 = vpush %v126_v11 }
 0x19f   :  { %s146_s21 = spop %145 }
 0x1a0   :  { %v128_v12 = vstv %s146_s21 }
 0x1a1   :  { %129 = vst [vmem:[#allocation5] sm:$0x1] %v128_v12 }
 0x1a2   :  { %198 = shalt.err (!%p195_p12)
}
 0x1a3   :  { %s199_s26 = scalar_lea.hbm %s259_s1, 16 }
 0x1a4   :  { %p200_p13 = scmp.ne.s32.totalorder %s259_s1, %s199_s26  ;;  %p203_p0 = scmp.lt.u32.totalorder %s199_s26, %s259_s1 }
 0x1a6   :  { %p205_p1 = pnand %p203_p0, %p200_p13 }
 0x1a8   :  { %208 = shalt.err (!%p205_p1)
}
 0x1a9   :  { %139 = dma.vmem_to_hbm [thread:$0]  %s137_s20, 16, %s259_s1, [#allocation4]  }
 0x1aa   :  { %211 = dma.done.wait [#allocation4], 16  }
 0x1ab   :  { %212 = vsyncadd [#allocation4], 4294967280 }
 0x1ac   :  { %143 = vsyncpa [#allocation3], 1 }
 0x1ad   :  { %144 = vsyncpa [#allocation4], 1 }

</bundles_post_ra>
